<compile_context>
chip_gen: v6e
topology: v6e:2x2x1
jax: 0.10.0
libtpu: 0.0.40
codegen_flags: <defaults>
</compile_context>

<pallas_src>
import functools

import jax
import jax.numpy as jnp
from jax.experimental import pallas as pl
from jax.experimental.pallas import tpu as pltpu


# ----------------------------------------------------------------------------
# Core kernel: one row tile of  out = x @ W + bias
# ----------------------------------------------------------------------------
def _matmul_bias_kernel(x_ref, w_ref, b_ref, o_ref):
    # x_ref: (TR, M)   w_ref: (M, N)   b_ref: (1, N) float32   o_ref: (TR, N)
    acc = jnp.dot(x_ref[...], w_ref[...], preferred_element_type=jnp.float32)
    o_ref[...] = (acc + b_ref[...]).astype(o_ref.dtype)


def _pick_row_tile(rows, m, n, itemsize, budget_bytes=16 * 1024 * 1024):
    """Largest row tile (<=1024, multiple of 8) whose double-buffered x/out
    tiles plus the VMEM-resident W/bias stay well inside a budget that is safe
    on every TPU generation (v5e 16 MiB scoped default, v7x 64 MiB physical)."""
    resident = m * n * itemsize + n * 4
    tr = 1024
    while tr > 8 and resident + 2 * tr * (m + n) * itemsize > budget_bytes:
        tr //= 2
    if rows <= tr:
        # Block equal to the full array dim is always a legal block shape.
        return max(int(rows), 1)
    return tr


def _matmul_bias_rows(x2d, w2d, b2d):
    """x2d: (R, M), w2d: (M, N), b2d: (1, N) float32 -> (R, N) in x2d.dtype."""
    R, M = x2d.shape
    N = w2d.shape[-1]
    itemsize = jnp.dtype(x2d.dtype).itemsize
    tr = _pick_row_tile(R, M, N, itemsize)
    return pl.pallas_call(
        _matmul_bias_kernel,
        out_shape=jax.ShapeDtypeStruct((R, N), x2d.dtype),
        grid=(pl.cdiv(R, tr),),
        in_specs=[
            # Row-tiled activations: pipelined (double-buffered) HBM->VMEM DMA.
            pl.BlockSpec((tr, M), lambda i: (i, 0)),
            # Weight + bias: block index never changes -> fetched once, resident.
            pl.BlockSpec((M, N), lambda i: (0, 0)),
            pl.BlockSpec((1, N), lambda i: (0, 0)),
        ],
        out_specs=pl.BlockSpec((tr, N), lambda i: (i, 0)),
        compiler_params=pltpu.CompilerParams(
            # Row tiles are independent: shard across both TensorCores on v7x.
            dimension_semantics=("parallel",),
            vmem_limit_bytes=32 * 1024 * 1024,
        ),
    )(x2d, w2d, b2d)


# ----------------------------------------------------------------------------
# Grouped path: lane-pack groups via a block-diagonal weight (no HBM transpose)
# ----------------------------------------------------------------------------
_PACKED_W_BUDGET_BYTES = 4 * 1024 * 1024


def _block_diag(w):
    """(Gc, M, N) -> block-diagonal (Gc*M, Gc*N)."""
    Gc, M, N = w.shape
    eye = jnp.eye(Gc, dtype=w.dtype)
    return (w[:, :, None, :] * eye[:, None, :, None]).reshape(Gc * M, Gc * N)


def _pick_group_chunk(G, M, N, itemsize):
    gc = G
    while gc > 1 and gc * gc * M * N * itemsize > _PACKED_W_BUDGET_BYTES:
        gc = (gc + 1) // 2
    return gc


def _grouped_blockdiag_forward(x, W, b, group_chunk):
    """x: (B, G, M), W: (G, M, N), b: (G, N) float32 -> (B, G, N)."""
    B, G, M = x.shape
    N = W.shape[-1]
    chunks = []
    for g0 in range(0, G, group_chunk):
        g1 = min(g0 + group_chunk, G)
        ng = g1 - g0
        xg = x[:, g0:g1, :].reshape(B, ng * M)   # no-copy reshape when ng == G
        wbd = _block_diag(W[g0:g1])              # (ng*M, ng*N)
        bbd = b[g0:g1].reshape(1, ng * N)
        og = _matmul_bias_rows(xg, wbd, bbd)     # (B, ng*N) lane-packed output
        chunks.append(og.reshape(B, ng, N))
    return chunks[0] if len(chunks) == 1 else jnp.concatenate(chunks, axis=1)


# ----------------------------------------------------------------------------
# Module forward
# ----------------------------------------------------------------------------
@functools.partial(jax.jit, static_argnames=("groups", "cformat"))
def conv1d1x1_forward(x, W, bias, *, groups, cformat="channel-first"):
    """Forward pass of Conv1d1x1.

    groups == 1 : x (B, C, M), W (M, N), bias (1, N) or None
    groups  > 1 : x (B, G, M), W (G, M, N), bias (G, N) or None
    """
    if cformat not in ("channel-first", "channel-last"):
        raise AssertionError("unknown cformat")
    if cformat == "channel-last":
        # (B, M, C) -> channel-first (B, C, M); transposed back at the end.
        # TODO(synk): fold this transpose into the kernel index_map if the
        # channel-last path ever becomes hot.
        x = jnp.swapaxes(x, 1, 2)

    B, C, M = x.shape
    W = W.astype(x.dtype)

    if groups == 1:
        N = W.shape[-1]
        b = (jnp.zeros((1, N), jnp.float32) if bias is None
             else bias.reshape(1, N).astype(jnp.float32))
        out = _matmul_bias_rows(x.reshape(B * C, M), W, b).reshape(B, C, N)
    else:
        G, M2, N = W.shape
        assert C == G and M == M2
        b = (jnp.zeros((G, N), jnp.float32) if bias is None
             else bias.astype(jnp.float32))
        gc = _pick_group_chunk(G, M, N, jnp.dtype(x.dtype).itemsize)
        out = _grouped_blockdiag_forward(x, W, b, gc)

    if cformat == "channel-last":
        out = jnp.swapaxes(out, 1, 2)
    return out


def init_params(key, cin, cout, groups, bias=True, dtype=jnp.float32):
    """Deterministic param init matching the module's __init__ (randn W, zero bias)."""
    if groups == 1:
        W = jax.random.normal(key, (cin, cout), dtype)
        b = jnp.zeros((1, cout), dtype) if bias else None
    else:
        W = jax.random.normal(key, (groups, cin, cout), dtype)
        b = jnp.zeros((groups, cout), dtype) if bias else None
    return W, b


if __name__ == "__main__":
    key = jax.random.PRNGKey(0)
    kx1, kw1, kx2, kw2, kx4 = jax.random.split(key, 5)

    # ---- case 1: groups == 1, channel-first, small ----
    B, C, cin, cout = 2, 8, 16, 32
    x1 = jax.random.normal(kx1, (B, C, cin), jnp.float32)
    W1, b1 = init_params(kw1, cin, cout, groups=1)
    out1 = conv1d1x1_forward(x1, W1, b1, groups=1, cformat="channel-first")
    ref1 = jnp.einsum("bcm,mn->bcn", x1, W1) + b1

    # ---- case 2: groups > 1, channel-first (lane-packed groups, G*N = 128) ----
    G = 4
    x2 = jax.random.normal(kx2, (B, G, cin), jnp.float32)
    W2, b2 = init_params(kw2, cin, cout, groups=G)
    out2 = conv1d1x1_forward(x2, W2, b2, groups=G, cformat="channel-first")
    ref2 = jnp.einsum("bcm,cmn->bcn", x2, W2) + b2

    # ---- case 2b: same problem forced through the chunked-group path ----
    out2b = _grouped_blockdiag_forward(
        x2, W2, b2.astype(jnp.float32), group_chunk=2)

    # ---- case 3: groups > 1, channel-last (transpose glue around same kernel) ----
    x3 = jnp.swapaxes(x2, 1, 2)  # (B, M, C)
    out3 = conv1d1x1_forward(x3, W2, b2, groups=G, cformat="channel-last")
    ref3 = jnp.einsum("bmc,cmn->bnc", x3, W2) + b2.T

    # ---- case 4: groups == 1 with enough rows to exercise row tiling
    #              (grid > 1 and a partial final row tile) ----
    C4 = 600                      # B*C4 = 1200 rows > 1024-row tile
    x4 = jax.random.normal(kx4, (B, C4, cin), jnp.float32)
    out4 = conv1d1x1_forward(x4, W1, b1, groups=1, cformat="channel-first")
    ref4 = jnp.einsum("bcm,mn->bcn", x4, W1) + b1

    # ---- case 5: bf16 activations/weights (f32 MXU accumulation inside) ----
    out5 = conv1d1x1_forward(x1.astype(jnp.bfloat16), W1.astype(jnp.bfloat16),
                             b1, groups=1, cformat="channel-first")

    jax.block_until_ready((out1, out2, out2b, out3, out4, out5))

    assert out1.shape == (B, C, cout) and jnp.allclose(out1, ref1, atol=1e-4, rtol=1e-4)
    assert out2.shape == (B, G, cout) and jnp.allclose(out2, ref2, atol=1e-4, rtol=1e-4)
    assert out2b.shape == (B, G, cout) and jnp.allclose(out2b, ref2, atol=1e-4, rtol=1e-4)
    assert out3.shape == (B, cout, G) and jnp.allclose(out3, ref3, atol=1e-4, rtol=1e-4)
    assert out4.shape == (B, C4, cout) and jnp.allclose(out4, ref4, atol=1e-4, rtol=1e-4)
    assert out5.shape == (B, C, cout) and jnp.allclose(
        out5.astype(jnp.float32), ref1, atol=0.25, rtol=0.05)

    print("KERNEL_OK")
</pallas_src>

<mosaic_0001>
module attributes {stable_mosaic.version = 11 : i64} {
  func.func @_matmul_bias_kernel(%arg0: i32, %arg1: memref<16x16xf32, #tpu.memory_space<vmem>>, %arg2: memref<16x32xf32, #tpu.memory_space<vmem>>, %arg3: memref<1x32xf32, #tpu.memory_space<vmem>>, %arg4: memref<16x32xf32, #tpu.memory_space<vmem>>) attributes {dimension_semantics = [#tpu.dimension_semantics<parallel>], iteration_bounds = array<i64: 1>, scalar_prefetch = 0 : i64, scratch_operands = 0 : i64, tpu.core_type = #tpu.core_type<tc>, window_params = [{transform_indices = @transform_0, window_bounds = array<i64: 16, 16>}, {pipeline_mode = #tpu.pipeline_mode<synchronous>, transform_indices = @transform_1, window_bounds = array<i64: 16, 32>}, {pipeline_mode = #tpu.pipeline_mode<synchronous>, transform_indices = @transform_2, window_bounds = array<i64: 1, 32>}, {transform_indices = @transform_3, window_bounds = array<i64: 16, 32>}]} {
    %c0 = arith.constant 0 : index
    %c0_0 = arith.constant 0 : index
    %0 = vector.load %arg1[%c0, %c0_0] : memref<16x16xf32, #tpu.memory_space<vmem>>, vector<16x16xf32>
    %c0_1 = arith.constant 0 : index
    %c0_2 = arith.constant 0 : index
    %1 = vector.load %arg2[%c0_1, %c0_2] : memref<16x32xf32, #tpu.memory_space<vmem>>, vector<16x32xf32>
    %cst = arith.constant dense<0.000000e+00> : vector<16x32xf32>
    %2 = tpu.matmul %0, %1, %cst {dimension_numbers = #tpu.dot_dimension_numbers<[1], [0], [0], [1], [0, 0, 1, 1], [], []>} : vector<16x16xf32>, vector<16x32xf32>, vector<16x32xf32> -> vector<16x32xf32>
    %c0_3 = arith.constant 0 : index
    %c0_4 = arith.constant 0 : index
    %3 = vector.load %arg3[%c0_3, %c0_4] : memref<1x32xf32, #tpu.memory_space<vmem>>, vector<1x32xf32>
    %4 = vector.broadcast %3 : vector<1x32xf32> to vector<16x32xf32>
    %5 = arith.addf %2, %4 : vector<16x32xf32>
    %c0_5 = arith.constant 0 : index
    %c0_6 = arith.constant 0 : index
    %6 = vector.load %arg4[%c0_5, %c0_6] : memref<16x32xf32, #tpu.memory_space<vmem>>, vector<16x32xf32>
    tpu.vector_store %arg4[%c0_5, %c0_6], %5 {strides = array<i32>} : memref<16x32xf32, #tpu.memory_space<vmem>>, vector<16x32xf32>,
    return
  }
  func.func @transform_0(%arg0: i32) -> (i32, i32) {
    %c0_i32 = arith.constant 0 : i32
    %c0_i32_0 = arith.constant 0 : i32
    return %arg0, %c0_i32 : i32, i32
  }
  func.func @transform_1(%arg0: i32) -> (i32, i32) {
    %c0_i32 = arith.constant 0 : i32
    %c0_i32_0 = arith.constant 0 : i32
    %c0_i32_1 = arith.constant 0 : i32
    return %c0_i32, %c0_i32_0 : i32, i32
  }
  func.func @transform_2(%arg0: i32) -> (i32, i32) {
    %c0_i32 = arith.constant 0 : i32
    %c0_i32_0 = arith.constant 0 : i32
    %c0_i32_1 = arith.constant 0 : i32
    return %c0_i32, %c0_i32_0 : i32, i32
  }
  func.func @transform_3(%arg0: i32) -> (i32, i32) {
    %c0_i32 = arith.constant 0 : i32
    %c0_i32_0 = arith.constant 0 : i32
    return %arg0, %c0_i32 : i32, i32
  }
}

</mosaic_0001>

<bundles_post_ra>
// kernel: conv1d1x1_forward.1
= control target key start
LH: loop header
LB: loop body
LE: loop exit
PB: predicated region body
PF: predicated region fallthrough
CT: control target
= control target key end

     0   :  { %8 = vsyncpa [#allocation3], 0  ;;  %s288_s0 = inlined_call_operand.hbm [shape: f32[16,16], index: 0, kind: input, shape index: {}]   ;;  %s289_s1 = inlined_call_operand.hbm [shape: f32[16,32], index: 1, kind: input, shape index: {}]   ;;  %s290_s2 = inlined_call_operand.vmem [shape: f32[1,32], index: 2, kind: input, shape index: {}]   ;;  %s291_s3 = inlined_call_operand.hbm [shape: f32[16,32], index: 3, kind: output, shape index: {}]  }
   0x1   :  { %9 = vsyncpa [#allocation6], 0 }
   0x2   :  { %10 = vsyncpa [#allocation4], 0  ;;  %s242_s12 = smov [#allocation2]  }
   0x3   :  { %s16_s13 = sshll.u32 %s242_s12, 4  ;;  %s17_s13 = int_to_ptr.vmem [resolvable:$true] %s16_s13 }
   0x4   :  { %s184_s14 = scalar_lea.vmem %s17_s13, 256  ;;  %p189_p1 = scmp.lt.s32.totalorder %s17_s13, %s17_s13 }
   0x5   :  { %p185_p0 = scmp.ne.s32.totalorder %s17_s13, %s184_s14  ;;  %p190_p2 = scmp.lt.s32.totalorder %s184_s14, %s184_s14 }
   0x7   :  { %p191_p3 = por %p190_p2, %p189_p1 }
   0x9   :  { %p192_p4 = pnand %p191_p3, %p185_p0 }
   0xb   :  { %195 = shalt.err (!%p192_p4)
}
   0xc   :  { %s243_s15 = smov 128   ;;  %s244_s16 = smov 8  }
   0xd   :  { %22 = dma.hbm_to_vmem [thread:$0]  %s288_s0, 256, %s17_s13, [#allocation3], %s243_s15, %s243_s15, %s244_s16  }
   0xe   :  { %s245_s19 = smov [#allocation5]  }
   0xf   :  { %s28_s20 = sshll.u32 %s245_s19, 4  ;;  %s29_s20 = int_to_ptr.vmem [resolvable:$true] %s28_s20 }
  0x10   :  { %s204_s21 = scalar_lea.vmem %s29_s20, 256  ;;  %p209_p6 = scmp.lt.s32.totalorder %s29_s20, %s29_s20 }
  0x11   :  { %p205_p5 = scmp.ne.s32.totalorder %s29_s20, %s204_s21  ;;  %p210_p7 = scmp.lt.s32.totalorder %s204_s21, %s204_s21 }
  0x13   :  { %p211_p8 = por %p210_p7, %p209_p6 }
  0x15   :  { %p212_p9 = pnand %p211_p8, %p205_p5 }
  0x17   :  { %215 = shalt.err (!%p212_p9)
}
  0x18   :  { %34 = dma.hbm_to_vmem [thread:$0]  %s289_s1, 256, %s29_s20, [#allocation6], %s243_s15, %s243_s15, %s244_s16  }
  0x19   :  { %236 = dma.done.wait [#allocation3], 256  }
  0x1a   :  { %237 = vsyncadd [#allocation3], 4294967040 }
  0x1b   :  { %238 = dma.done.wait [#allocation6], 256  }
  0x1c   :  { %239 = vsyncadd [#allocation6], 4294967040  ;;  %vm54_vm0 = vcmask 130048   ;;  %v46_v0 = vld [vmem:[#allocation5 + $0x8] sm:$0xff]  ;;  %v45_v1 = vld [vmem:[#allocation5] sm:$0xff]  ;;  %vm136_vm1 = vcmask 261120  }
  0x1d   :  { %v43_v2 = vld [vmem:[#allocation2] sm:$0xff]  ;;  %164 = vmatprep.subr.mxu0 %v46_v0  ;;  %v44_v3 = vld [vmem:[#allocation2 + $0x8] sm:$0xff]  ;;  %s246_s1 = smov [#allocation7]  }
  0x1e   :  { %168 = vmatprep.mubr.msk.f32.mxu0 %vm54_vm0, %v43_v2  ;;  %165 = vmatpush3.msra.mxu0 %v46_v0  ;;  %v157_v4 = vld [vmem:[%s290_s2] ss:$0 sm:$0xff]  ;;  %s144_s25 = sshll.u32 %s246_s1, 4  ;;  %s145_s25 = int_to_ptr.vmem [resolvable:$true] %s144_s25 }
  0x1f   :  { %166 = vmatprep.subr.mxu0 %v45_v1  ;;  %s216_s26 = scalar_lea.vmem %s145_s25, 256  ;;  %p221_p11 = scmp.lt.s32.totalorder %s145_s25, %s145_s25 }
  0x20   :  { %167 = vmatpush3.msra.mxu0 %v45_v1  ;;  %p217_p10 = scmp.ne.s32.totalorder %s145_s25, %s216_s26  ;;  %p222_p12 = scmp.lt.s32.totalorder %s216_s26, %s216_s26 }
  0x21   :  { %169 = vmatmul.mubr.msk.f32.vlgmr.msra.gmra.mxu0 %vm54_vm0, %v44_v3 }
  0x22   :  { %p223_p13 = por %p222_p12, %p221_p11 }
  0x24   :  { %p224_p0 = pnand %p223_p13, %p217_p10 }
  0xe1   :  { %v170_v5 = vpop.f32.mrf.mxu0 }
  0xe2   :  { %v133_v6 = vadd.f32 %v170_v5, %v157_v4 }
  0xe3   :  { %v127_v7 = vpop.f32.mrf.mxu0 }
  0xe4   :  { %v128_v8 = vadd.f32 %v157_v4, %v127_v7  ;;  %138 = vst.msk [vmem:[#allocation7 + $0x8] sm:$0xff] %vm136_vm1, %v133_v6 }
  0xe6   :  { %137 = vst.msk [vmem:[#allocation7] sm:$0xff] %vm136_vm1, %v128_v8 }
  0xe7   :  { %227 = shalt.err (!%p224_p0)
}
  0xe8   :  { %150 = dma.vmem_to_hbm [thread:$0]  %s145_s25, 256, %s291_s3, [#allocation4], %s243_s15, %s243_s15, %s244_s16  }
  0xe9   :  { %240 = dma.done.wait [#allocation4], 256  }
  0xea   :  { %241 = vsyncadd [#allocation4], 4294967040 }
  0xeb   :  { %154 = vsyncpa [#allocation3], 1 }
  0xec   :  { %155 = vsyncpa [#allocation6], 1 }
  0xed   :  { %156 = vsyncpa [#allocation4], 1 }

</bundles_post_ra>
